<compile_context>
chip_gen: v7x
topology: tpu7x:2x2x1
jax: 0.10.0
libtpu: 0.0.40
codegen_flags: <defaults>
</compile_context>

<pallas_src>
import numpy as np
import jax
import jax.numpy as jnp
from jax import lax
from jax.experimental import pallas as pl
from jax.experimental.pallas import tpu as pltpu


def _adaptive_pool_matrix(in_size: int, out_size: int) -> np.ndarray:
    """Row-stochastic P (out, in) with P @ x == AdaptiveAvgPool1d(x) (PyTorch semantics)."""
    P = np.zeros((out_size, in_size), dtype=np.float32)
    for i in range(out_size):
        start = (i * in_size) // out_size
        end = -((-(i + 1) * in_size) // out_size)  # ceil((i+1)*in/out)
        P[i, start:end] = 1.0 / float(end - start)
    return P


def _kron_pool_matrix(H: int, W: int, out_hw: int) -> np.ndarray:
    """Fused 2D adaptive-avg-pool matrix K (out_hw*out_hw, H*W) = kron(P_h, P_w)."""
    return np.kron(_adaptive_pool_matrix(H, out_hw), _adaptive_pool_matrix(W, out_hw))


def _pick_batch_tile(B: int, max_bt: int) -> int:
    """Largest divisor of B that is <= max_bt and leaves a grid of >= 2 steps."""
    cap = max(1, min(max_bt, B // 2))  # grid >= 2 whenever B >= 2 (v7x megacore)
    bt = 1
    for d in range(1, cap + 1):
        if B % d == 0:
            bt = d
    return bt


def encoder_head_kernel(x_ref, w_ref, k_ref, b_ref, o_ref, conv_ref):
    """One batch tile: conv-first 1x1 conv, then fused adaptive-avg-pool.

    x_ref    : (bt, HW, C)      bf16  backbone features in (B, H*W, C) layout
    w_ref    : (C, E_pad)       bf16  1x1-conv weight, pre-transposed, lane-padded
    k_ref    : (P, HW)          bf16  fused adaptive-avg-pool matrix
    b_ref    : (1, E_pad)       f32   1x1-conv bias, lane-padded
    o_ref    : (bt, P, E_pad)   f32   output slab (== flatten(2).permute(0, 2, 1))
    conv_ref : (bt, HW, E_pad)  bf16  VMEM scratch for the conv intermediate
    """
    bt, hw, c = x_ref.shape
    p, e_pad = o_ref.shape[1], o_ref.shape[2]

    # Batch-invariant loads / broadcast hoisted above the per-image loop.
    w = w_ref[...]                                       # (C, E_pad)
    k = k_ref[...]                                       # (P, HW)
    bias = jnp.broadcast_to(b_ref[...], (p, e_pad))      # (P, E_pad) f32

    flat = (hw % 8) == 0  # leading-dim merge is relayout-free only if HW | sublanes
    if flat:
        # ONE MXU matmul over the whole batch tile: (bt*HW, C) @ (C, E_pad) -> f32.
        conv = jnp.dot(x_ref[...].reshape(bt * hw, c), w,
                       preferred_element_type=jnp.float32)
        conv_ref[...] = conv.reshape(bt, hw, e_pad).astype(conv_ref.dtype)

    def pool_one(i, carry):
        if flat:
            ci = conv_ref[i]                                             # (HW, E_pad) bf16
        else:
            # Fallback (e.g. HW == 196): per-image conv matmul, still conv-first.
            ci = jnp.dot(x_ref[i], w,
                         preferred_element_type=jnp.float32).astype(k.dtype)
        pooled = jnp.dot(k, ci, preferred_element_type=jnp.float32)      # (P, E_pad) f32
        o_ref[i] = (pooled + bias).astype(o_ref.dtype)
        return carry

    lax.fori_loop(0, bt, pool_one, 0, unroll=True)


def cnn_encoder_head(features, conv_w, conv_b, out_hw: int = 14, max_batch_tile: int = 4):
    """adaptive_pool(14,14) -> conv1x1 -> flatten(2).permute(0,2,1) as one Pallas call.

    features: (B, C, H, W) f32 backbone feature map (NCHW)
    conv_w  : (E, C) or (E, C, 1, 1) 1x1-conv weight
    conv_b  : (E,) bias
    returns : (B, out_hw*out_hw, E) f32
    """
    B, C, H, W = features.shape
    E = int(conv_b.shape[0])
    HW = H * W
    P = out_hw * out_hw
    E_pad = max(128, ((E + 127) // 128) * 128)  # lane-dense output / full MXU N width
    bt = _pick_batch_tile(B, max_batch_tile)

    # Host-side layout plumbing: NCHW -> (B, HW, C) bf16 in ONE fused XLA pass.
    x = features.reshape(B, C, HW).transpose(0, 2, 1).astype(jnp.bfloat16)      # (B, HW, C)
    kmat = jnp.asarray(_kron_pool_matrix(H, W, out_hw), dtype=jnp.bfloat16)     # (P, HW)
    w_t = jnp.zeros((C, E_pad), jnp.bfloat16)
    w_t = w_t.at[:, :E].set(jnp.reshape(conv_w, (E, C)).T.astype(jnp.bfloat16))  # (C, E_pad)
    bias = jnp.zeros((1, E_pad), jnp.float32).at[:, :E].set(
        jnp.reshape(conv_b, (1, E)).astype(jnp.float32))                         # (1, E_pad)

    # Explicit scoped-VMEM budget: double-buffered blocks + scratch + f32 temporaries.
    blk = (2 * (bt * HW * C * 2 + bt * P * E_pad * 4
                + P * HW * 2 + C * E_pad * 2 + E_pad * 4)
           + bt * HW * E_pad * (2 + 4) + 2 * P * E_pad * 4)
    vmem_limit = int(min(64 * 2 ** 20, max(2 * blk, 32 * 2 ** 20)))

    flops = 2 * B * (HW * C * E_pad + P * HW * E_pad)
    bytes_accessed = (x.size * 2 + B * P * E_pad * 4
                      + kmat.size * 2 + w_t.size * 2 + E_pad * 4)

    out = pl.pallas_call(
        encoder_head_kernel,
        out_shape=jax.ShapeDtypeStruct((B, P, E_pad), jnp.float32),
        grid=(B // bt,),
        in_specs=[
            pl.BlockSpec((bt, HW, C), lambda g: (g, 0, 0)),   # features (batch-tiled)
            pl.BlockSpec((C, E_pad), lambda g: (0, 0)),       # weight (grid-invariant)
            pl.BlockSpec((P, HW), lambda g: (0, 0)),          # pool matrix (grid-invariant)
            pl.BlockSpec((1, E_pad), lambda g: (0, 0)),       # bias (grid-invariant)
        ],
        out_specs=pl.BlockSpec((bt, P, E_pad), lambda g: (g, 0, 0)),
        scratch_shapes=[pltpu.VMEM((bt, HW, E_pad), jnp.bfloat16)],
        compiler_params=pltpu.CompilerParams(
            dimension_semantics=("parallel",),                # batch axis -> v7x megacore
            vmem_limit_bytes=vmem_limit),
        cost_estimate=pl.CostEstimate(flops=flops, transcendentals=0,
                                      bytes_accessed=bytes_accessed),
    )(x, w_t, kmat, bias)

    return out[:, :, :E]   # no-op slice when E % 128 == 0 (production)


def _reference_fp32(features, conv_w, conv_b, out_hw: int = 14):
    """Pure fp32 reference mirroring the PyTorch module: pool -> conv1x1 -> permute."""
    B, C, H, W = features.shape
    E = int(conv_b.shape[0])
    kmat = jnp.asarray(_kron_pool_matrix(H, W, out_hw), dtype=jnp.float32)       # (P, HW)
    x = features.reshape(B, C, H * W)                                            # (B, C, HW)
    pooled = jnp.einsum('px,bcx->bcp', kmat, x, precision=lax.Precision.HIGHEST)  # (B, C, P)
    conv = jnp.einsum('ec,bcp->bep', jnp.reshape(conv_w, (E, C)), pooled,
                      precision=lax.Precision.HIGHEST) + conv_b[None, :, None]    # (B, E, P)
    return conv.transpose(0, 2, 1)                                                # (B, P, E)


if __name__ == "__main__":
    # Small demo shapes: batch=2, backbone channels=64 (stand-in for 2048),
    # spatial 16x16 feature map, embed_size=32.
    B, C, H, W, E = 2, 64, 16, 16, 32

    key = jax.random.PRNGKey(0)
    k_feat, k_w, k_b = jax.random.split(key, 3)
    features = jax.random.normal(k_feat, (B, C, H, W), dtype=jnp.float32)
    conv_w = jax.random.normal(k_w, (E, C), dtype=jnp.float32) * (1.0 / np.sqrt(C))
    conv_b = jax.random.normal(k_b, (E,), dtype=jnp.float32) * 0.01

    out = jax.block_until_ready(cnn_encoder_head(features, conv_w, conv_b))
    assert out.shape == (B, 14 * 14, E), out.shape

    ref = jax.block_until_ready(_reference_fp32(features, conv_w, conv_b))
    # bf16 operands / f32 accumulation vs the fp32 module: errors are O(1e-3).
    np.testing.assert_allclose(np.asarray(out), np.asarray(ref), rtol=2e-2, atol=2e-2)

    print("KERNEL_OK")
</pallas_src>

<mosaic_0001>
module attributes {stable_mosaic.version = 11 : i64} {
  func.func @encoder_head_kernel(%arg0: i32, %arg1: memref<1x256x64xbf16, #tpu.memory_space<vmem>>, %arg2: memref<64x128xbf16, #tpu.memory_space<vmem>>, %arg3: memref<196x256xbf16, #tpu.memory_space<vmem>>, %arg4: memref<1x128xf32, #tpu.memory_space<vmem>>, %arg5: memref<1x196x128xf32, #tpu.memory_space<vmem>>, %arg6: memref<1x256x128xbf16, #tpu.memory_space<vmem>>) attributes {dimension_semantics = [#tpu.dimension_semantics<parallel>], iteration_bounds = array<i64: 2>, scalar_prefetch = 0 : i64, scratch_operands = 1 : i64, tpu.core_type = #tpu.core_type<tc>, window_params = [{transform_indices = @transform_0, window_bounds = array<i64: 1, 256, 64>}, {pipeline_mode = #tpu.pipeline_mode<synchronous>, transform_indices = @transform_1, window_bounds = array<i64: 64, 128>}, {pipeline_mode = #tpu.pipeline_mode<synchronous>, transform_indices = @transform_2, window_bounds = array<i64: 196, 256>}, {pipeline_mode = #tpu.pipeline_mode<synchronous>, transform_indices = @transform_3, window_bounds = array<i64: 1, 128>}, {transform_indices = @transform_4, window_bounds = array<i64: 1, 196, 128>}]} {
    %c0 = arith.constant 0 : index
    %c0_0 = arith.constant 0 : index
    %0 = vector.load %arg2[%c0, %c0_0] : memref<64x128xbf16, #tpu.memory_space<vmem>>, vector<64x128xbf16>
    %c0_1 = arith.constant 0 : index
    %c0_2 = arith.constant 0 : index
    %1 = vector.load %arg3[%c0_1, %c0_2] : memref<196x256xbf16, #tpu.memory_space<vmem>>, vector<196x256xbf16>
    %c0_3 = arith.constant 0 : index
    %c0_4 = arith.constant 0 : index
    %2 = vector.load %arg4[%c0_3, %c0_4] : memref<1x128xf32, #tpu.memory_space<vmem>>, vector<1x128xf32>
    %3 = vector.shape_cast %2 : vector<1x128xf32> to vector<1x128xf32>
    %4 = vector.broadcast %3 : vector<1x128xf32> to vector<196x128xf32>
    %c0_5 = arith.constant 0 : index
    %c0_6 = arith.constant 0 : index
    %c0_7 = arith.constant 0 : index
    %5 = vector.load %arg1[%c0_5, %c0_6, %c0_7] : memref<1x256x64xbf16, #tpu.memory_space<vmem>>, vector<1x256x64xbf16>
    %6 = vector.shape_cast %5 : vector<1x256x64xbf16> to vector<256x64xbf16>
    %cst = arith.constant dense<0.000000e+00> : vector<256x128xf32>
    %7 = tpu.matmul %6, %0, %cst {dimension_numbers = #tpu.dot_dimension_numbers<[1], [0], [0], [1], [0, 0, 1, 1], [], []>} : vector<256x64xbf16>, vector<64x128xbf16>, vector<256x128xf32> -> vector<256x128xf32>
    %8 = vector.shape_cast %7 : vector<256x128xf32> to vector<1x256x128xf32>
    %9 = arith.truncf %8 : vector<1x256x128xf32> to vector<1x256x128xbf16>
    %c0_8 = arith.constant 0 : index
    %c0_9 = arith.constant 0 : index
    %c0_10 = arith.constant 0 : index
    %10 = vector.load %arg6[%c0_8, %c0_9, %c0_10] : memref<1x256x128xbf16, #tpu.memory_space<vmem>>, vector<1x256x128xbf16>
    tpu.vector_store %arg6[%c0_8, %c0_9, %c0_10], %9 {strides = array<i32>} : memref<1x256x128xbf16, #tpu.memory_space<vmem>>, vector<1x256x128xbf16>,
    %c0_i32 = arith.constant 0 : i32
    %11 = arith.index_cast %c0_i32 : i32 to index
    %c0_11 = arith.constant 0 : index
    %c0_12 = arith.constant 0 : index
    %12 = vector.load %arg6[%11, %c0_11, %c0_12] : memref<1x256x128xbf16, #tpu.memory_space<vmem>>, vector<1x256x128xbf16>
    %13 = vector.shape_cast %12 : vector<1x256x128xbf16> to vector<256x128xbf16>
    %cst_13 = arith.constant dense<0.000000e+00> : vector<196x128xf32>
    %14 = tpu.matmul %1, %13, %cst_13 {dimension_numbers = #tpu.dot_dimension_numbers<[1], [0], [0], [1], [0, 0, 1, 1], [], []>} : vector<196x256xbf16>, vector<256x128xbf16>, vector<196x128xf32> -> vector<196x128xf32>
    %15 = arith.addf %14, %4 : vector<196x128xf32>
    %16 = arith.index_cast %c0_i32 : i32 to index
    %c0_14 = arith.constant 0 : index
    %c0_15 = arith.constant 0 : index
    %17 = vector.load %arg5[%16, %c0_14, %c0_15] : memref<1x196x128xf32, #tpu.memory_space<vmem>>, vector<1x196x128xf32>
    %18 = vector.shape_cast %17 : vector<1x196x128xf32> to vector<196x128xf32>
    %19 = vector.shape_cast %15 : vector<196x128xf32> to vector<1x196x128xf32>
    tpu.vector_store %arg5[%16, %c0_14, %c0_15], %19 {strides = array<i32>} : memref<1x196x128xf32, #tpu.memory_space<vmem>>, vector<1x196x128xf32>,
    %c1_i32 = arith.constant 1 : i32
    return
  }
  func.func @transform_0(%arg0: i32) -> (i32, i32, i32) {
    %c0_i32 = arith.constant 0 : i32
    %c0_i32_0 = arith.constant 0 : i32
    %c0_i32_1 = arith.constant 0 : i32
    return %arg0, %c0_i32, %c0_i32_0 : i32, i32, i32
  }
  func.func @transform_1(%arg0: i32) -> (i32, i32) {
    %c0_i32 = arith.constant 0 : i32
    %c0_i32_0 = arith.constant 0 : i32
    %c0_i32_1 = arith.constant 0 : i32
    return %c0_i32, %c0_i32_0 : i32, i32
  }
  func.func @transform_2(%arg0: i32) -> (i32, i32) {
    %c0_i32 = arith.constant 0 : i32
    %c0_i32_0 = arith.constant 0 : i32
    %c0_i32_1 = arith.constant 0 : i32
    return %c0_i32, %c0_i32_0 : i32, i32
  }
  func.func @transform_3(%arg0: i32) -> (i32, i32) {
    %c0_i32 = arith.constant 0 : i32
    %c0_i32_0 = arith.constant 0 : i32
    %c0_i32_1 = arith.constant 0 : i32
    return %c0_i32, %c0_i32_0 : i32, i32
  }
  func.func @transform_4(%arg0: i32) -> (i32, i32, i32) {
    %c0_i32 = arith.constant 0 : i32
    %c0_i32_0 = arith.constant 0 : i32
    %c0_i32_1 = arith.constant 0 : i32
    return %arg0, %c0_i32, %c0_i32_0 : i32, i32, i32
  }
}

</mosaic_0001>

<bundles_post_ra>
// kernel: tpu_custom_call.1
= control target key start
LH: loop header
LB: loop body
LE: loop exit
PB: predicated region body
PF: predicated region fallthrough
CT: control target
= control target key end

     0   :  { %s1320_s15 = smov 0   ;;  %s1519_s0 = inlined_call_operand.vmem [shape: bf16[2,256,64], index: 0, kind: input, shape index: {}]   ;;  %s1520_s1 = inlined_call_operand.vmem [shape: bf16[64,128], index: 1, kind: input, shape index: {}]   ;;  %s1521_s2 = inlined_call_operand.vmem [shape: bf16[196,256], index: 2, kind: input, shape index: {}]   ;;  %s1522_s3 = inlined_call_operand.vmem [shape: f32[1,128], index: 3, kind: input, shape index: {}]   ;;  %s1523_s4 = inlined_call_operand.vmem [shape: f32[2,196,128], index: 4, kind: output, shape index: {}]  }
   0x1 LB: > { %s976_s16 = sadd.s32 4294967295, %s1293_s15   ;;  %p980_p0 = scmp.ge.s32.totalorder %s1293_s15, 1  ;;  %s1293_s15 = sphi %s1320_s15, %s14_s15  }
   0x2   : > { %p162_p1 = scmp.lt.s32.totalorder %s1293_s15, 3 }
   0x4   : > { %p163_p2 = pnand %p980_p0, %p162_p1 }
   0x5   : > { %v1229_v0 = vld [vmem:[%s1520_s1] sm:$0xff] (!%p163_p2)   ;;  %p188_p3 = scmp.lt.s32.totalorder (!%p163_p2), %s976_s16, 1  ;;  %v1230_v1 = vld [vmem:[%s1520_s1 + $0x8] sm:$0xff] (!%p163_p2)   ;;  %v1231_v2 = vld [vmem:[%s1520_s1 + $0x10] sm:$0xff] (!%p163_p2)   ;;  %vm375_vm0 = vcmask (!%p163_p2), 523264  }
   0x6   : > { %166 = sbr.rel (%p163_p2) target bundleno = 593 (0x251), region = 36  ;;  %1164 = vmatprep.subr.bf16.mxu0 (!%p163_p2), %v1229_v0  ;;  %v1232_v4 = vld [vmem:[%s1520_s1 + $0x18] sm:$0xff] (!%p163_p2)   ;;  %v1272_v21 = vld [vmem:[%s1521_s2 + $0x4] ss:$8 sps:$4 sm:$0xff] (!%p163_p2)  }
   0x7   : > { %1165 = vmatpush3.bf16.msra.mxu0 (!%p163_p2), %v1229_v0  ;;  %v1251_v20 = vld [vmem:[%s1521_s2 + $0x34] ss:$8 sps:$4 sm:$0xff] (!%p163_p2)  }
   0x8   : > { %1166 = vmatprep.subr.bf16.mxu0 (!%p163_p2), %v1230_v1  ;;  %816 = vmatprep.mubr.bf16.mxu1 (!%p163_p2), %v1251_v20  ;;  %v1264_v20 = vld [vmem:[%s1521_s2 + $0x84] ss:$8 sps:$4 sm:$0xff] (!%p163_p2)  }
   0xb   : > { %1167 = vmatpush3.bf16.msra.mxu0 (!%p163_p2), %v1230_v1 }
   0xc   : > { %1168 = vmatprep.subr.bf16.mxu0 (!%p163_p2), %v1231_v2 }
   0xd   : > { %s1525_s16 = smov (!%p188_p3, %s976_s16), 1 }
   0xe   : > { %s1049_s23 = sshll.u32 %s1525_s16, 7  ;;  %s1220_s5 = smul.u32 200, %s1525_s16 }
   0xf   : > { %s1343_s26 = scalar_lea.vmem %s1519_s0, %s1049_s23  ;;  %1169 = vmatpush3.bf16.msra.mxu0 %v1231_v2 }
  0x10   : > { %v1233_v3 = vld [vmem:[%s1343_s26] sm:$0xff]   ;;  %1170 = vmatprep.subr.bf16.mxu0 %v1232_v4  ;;  %v1234_v5 = vld [vmem:[%s1343_s26 + $0x8] sm:$0xff]   ;;  %v1235_v6 = vld [vmem:[%s1343_s26 + $0x10] sm:$0xff]   ;;  %s1464_s10 = scalar_lea.vmem %s1523_s4, %s1220_s5 }
  0x11   : > { %1172 = vmatprep.mubr.msk.bf16.mxu0 %vm375_vm0, %v1233_v3  ;;  %v1236_v7 = vld [vmem:[%s1343_s26 + $0x18] sm:$0xff]   ;;  %v1237_v8 = vld [vmem:[%s1343_s26 + $0x20] sm:$0xff]   ;;  %v1238_v9 = vld [vmem:[%s1343_s26 + $0x28] sm:$0xff]  }
  0x12   : > { %v1239_v10 = vld [vmem:[%s1343_s26 + $0x30] sm:$0xff]   ;;  %v1240_v11 = vld [vmem:[%s1343_s26 + $0x38] sm:$0xff]   ;;  %v1241_v12 = vld [vmem:[%s1343_s26 + $0x40] sm:$0xff]  }
  0x13   : > { %1171 = vmatpush3.bf16.msra.mxu0 %v1232_v4  ;;  %v1242_v13 = vld [vmem:[%s1343_s26 + $0x48] sm:$0xff]   ;;  %v1243_v14 = vld [vmem:[%s1343_s26 + $0x50] sm:$0xff]   ;;  %v1244_v15 = vld [vmem:[%s1343_s26 + $0x58] sm:$0xff]  }
  0x14   : > { %v1245_v16 = vld [vmem:[%s1343_s26 + $0x60] sm:$0xff]   ;;  %v1246_v17 = vld [vmem:[%s1343_s26 + $0x68] sm:$0xff]   ;;  %v1247_v18 = vld [vmem:[%s1343_s26 + $0x70] sm:$0xff]  }
  0x15   : > { %v1248_v19 = vld [vmem:[%s1343_s26 + $0x78] sm:$0xff]  }
  0x16   : > { %1173 = vmatmul.mubr.msk.bf16.vlgmr.msra.gmra.mrb[0].mxu0 %vm375_vm0, %v1234_v5 }
  0x17   : > { %1176 = vmatprep.mubr.msk.bf16.mxu0 %vm375_vm0, %v1235_v6  ;;  %v1249_v6 = vld [vmem:[%s1521_s2 + $0x30] ss:$8 sps:$4 sm:$0xff]  }
  0x1e   : > { %1177 = vmatmul.mubr.msk.bf16.gmra.mrb[4].mxu0 %vm375_vm0, %v1236_v7  ;;  %v1270_v7 = vld [vmem:[%s1521_s2] ss:$8 sps:$4 sm:$0xff]  }
  0x1f   : > { %1180 = vmatprep.mubr.msk.bf16.mxu0 %vm375_vm0, %v1237_v8  ;;  %v1252_v8 = vld [vmem:[%s1521_s2 + $0x44] ss:$8 sps:$4 sm:$0xff]  }
  0x26   : > { %1181 = vmatmul.mubr.msk.bf16.gmra.mrb[8].mxu0 %vm375_vm0, %v1238_v9  ;;  %v1276_v9 = vld [vmem:[%s1521_s2 + $0x14] ss:$8 sps:$4 sm:$0xff]  }
  0x27   : > { %1184 = vmatprep.mubr.msk.bf16.mxu0 %vm375_vm0, %v1239_v10  ;;  %v1254_v10 = vld [vmem:[%s1521_s2 + $0x40] ss:$8 sps:$4 sm:$0xff]  }
  0x2e   : > { %1185 = vmatmul.mubr.msk.bf16.gmra.mrb[12].mxu0 %vm375_vm0, %v1240_v11  ;;  %v1278_v11 = vld [vmem:[%s1521_s2 + $0x10] ss:$8 sps:$4 sm:$0xff]  }
  0x2f   : > { %1188 = vmatprep.mubr.msk.bf16.mxu0 %vm375_vm0, %v1241_v12  ;;  %v1255_v12 = vld [vmem:[%s1521_s2 + $0x54] ss:$8 sps:$4 sm:$0xff]  }
  0x36   : > { %1189 = vmatmul.mubr.msk.bf16.gmra.mrb[16].mxu0 %vm375_vm0, %v1242_v13  ;;  %v1282_v13 = vld [vmem:[%s1521_s2 + $0x24] ss:$8 sps:$4 sm:$0xff]  }
  0x37   : > { %1192 = vmatprep.mubr.msk.bf16.mxu0 %vm375_vm0, %v1243_v14  ;;  %v1257_v14 = vld [vmem:[%s1521_s2 + $0x50] ss:$8 sps:$4 sm:$0xff]  }
  0x3e   : > { %1193 = vmatmul.mubr.msk.bf16.gmra.mrb[20].mxu0 %vm375_vm0, %v1244_v15  ;;  %v1284_v15 = vld [vmem:[%s1521_s2 + $0x20] ss:$8 sps:$4 sm:$0xff]  }
  0x3f   : > { %1196 = vmatprep.mubr.msk.bf16.mxu0 %vm375_vm0, %v1245_v16  ;;  %v1258_v16 = vld [vmem:[%s1521_s2 + $0x64] ss:$8 sps:$4 sm:$0xff]  }
  0x46   : > { %1197 = vmatmul.mubr.msk.bf16.gmra.mrb[24].mxu0 %vm375_vm0, %v1246_v17  ;;  %v1260_v17 = vld [vmem:[%s1521_s2 + $0x60] ss:$8 sps:$4 sm:$0xff]  }
  0x47   : > { %1200 = vmatprep.mubr.msk.bf16.mxu0 %vm375_vm0, %v1247_v18  ;;  %v1261_v18 = vld [vmem:[%s1521_s2 + $0x74] ss:$8 sps:$4 sm:$0xff]  }
  0x4e   : > { %1201 = vmatmul.mubr.msk.bf16.gmra.mrb[28].mxu0 %vm375_vm0, %v1248_v19  ;;  %v1263_v19 = vld [vmem:[%s1521_s2 + $0x70] ss:$8 sps:$4 sm:$0xff]  }
  0x4f   : > { %792 = vmatprep.mubr.bf16.mxu0 %v1272_v21  ;;  %v1266_v21 = vld [vmem:[%s1521_s2 + $0x80] ss:$8 sps:$4 sm:$0xff]  }
  0xe9   : > { %v1174_v22 = vpop.f32.mrb[0].mxu0 }
  0xea   : > { %v458_v23 = vpop.f32.mrb[1].mxu0 }
  0xeb   : > { %v1175_v24 = vpop.f32.mrb[2].mxu0 }
  0xec   : > { %v586_v25 = vpack.c.bf16 %v1175_v24, %v1174_v22  ;;  %v461_v26 = vpop.f32.mrb[3].mxu0  ;;  %v1267_v22 = vld [vmem:[%s1521_s2 + $0x94] ss:$8 sps:$4 sm:$0xff]   ;;  %v1273_v24 = vld [vmem:[%s1521_s2 + $0xa4] ss:$8 sps:$4 sm:$0xff]  }
  0xed   : > { %v585_v27 = vpack.c.bf16 %v461_v26, %v458_v23  ;;  %v1269_v23 = vld [vmem:[%s1521_s2 + $0x90] ss:$8 sps:$4 sm:$0xff]   ;;  %v1279_v26 = vld [vmem:[%s1521_s2 + $0xb4] ss:$8 sps:$4 sm:$0xff]  }
  0xf1   : > { %v1178_v28 = vpop.f32.mrb[4].mxu0 }
  0xf2   : > { %v474_v29 = vpop.f32.mrb[5].mxu0 }
  0xf3   : > { %v1179_v30 = vpop.f32.mrb[6].mxu0 }
  0xf4   : > { %v588_v31 = vpack.c.bf16 %v1179_v30, %v1178_v28  ;;  %v477_v32 = vpop.f32.mrb[7].mxu0  ;;  %v1281_v28 = vld [vmem:[%s1521_s2 + $0xb0] ss:$8 sps:$4 sm:$0xff]  }
  0xf5   : > { %v587_v33 = vpack.c.bf16 %v477_v32, %v474_v29 }
  0xf9   : > { %v1182_v34 = vpop.f32.mrb[8].mxu0 }
  0xfa   : > { %v490_v35 = vpop.f32.mrb[9].mxu0 }
  0xfb   : > { %v1183_v36 = vpop.f32.mrb[10].mxu0 }
  0xfc   : > { %v590_v37 = vpack.c.bf16 %v1183_v36, %v1182_v34  ;;  %v493_v38 = vpop.f32.mrb[11].mxu0 }
  0xfd   : > { %v589_v39 = vpack.c.bf16 %v493_v38, %v490_v35 }
 0x101   : > { %v1186_v40 = vpop.f32.mrb[12].mxu0 }
 0x102   : > { %v506_v41 = vpop.f32.mrb[13].mxu0 }
 0x103   : > { %v1187_v42 = vpop.f32.mrb[14].mxu0 }
 0x104   : > { %v592_v43 = vpack.c.bf16 %v1187_v42, %v1186_v40  ;;  %v509_v44 = vpop.f32.mrb[15].mxu0 }
 0x105   : > { %v591_v45 = vpack.c.bf16 %v509_v44, %v506_v41 }
 0x109   : > { %v1190_v46 = vpop.f32.mrb[16].mxu0 }
 0x10a   : > { %v522_v47 = vpop.f32.mrb[17].mxu0 }
 0x10b   : > { %v1191_v48 = vpop.f32.mrb[18].mxu0 }
 0x10c   : > { %v594_v49 = vpack.c.bf16 %v1191_v48, %v1190_v46  ;;  %v525_v50 = vpop.f32.mrb[19].mxu0 }
 0x10d   : > { %v593_v51 = vpack.c.bf16 %v525_v50, %v522_v47 }
 0x10f   : > { %1070 = vmatprep.subr.bf16.mxu0 %v593_v51  ;;  %1204 = vmatprep.subr.bf16.mxu1 %v593_v51 }
 0x110   : > { %1071 = vmatpush3.bf16.msra.mxu0 %v585_v27  ;;  %1212 = vmatpush3.bf16.msra.mxu1 %v585_v27  ;;  %v231_v27 = vld [vmem:[%s1521_s2 + $0xc0] sm:$0x33] }
 0x111   : > { %v1194_v52 = vpop.f32.mrb[20].mxu0  ;;  %1072 = vmatprep.subr.bf16.mxu0 %v594_v49  ;;  %1205 = vmatprep.subr.bf16.mxu1 %v594_v49  ;;  %v1046_v29 = vcombine.high %v231_v27, %v231_v27  ;;  %v1045_v30 = vcombine.low %v231_v27, %v231_v27 }
 0x112   : > { %v538_v53 = vpop.f32.mrb[21].mxu0 }
 0x113   : > { %v1195_v54 = vpop.f32.mrb[22].mxu0 }
 0x114   : > { %v596_v55 = vpack.c.bf16 %v1195_v54, %v1194_v52  ;;  %v541_v56 = vpop.f32.mrb[23].mxu0  ;;  %1073 = vmatpush3.bf16.msra.mxu0 %v586_v25  ;;  %1213 = vmatpush3.bf16.msra.mxu1 %v586_v25  ;;  %v1275_v25 = vld [vmem:[%s1521_s2 + $0xa0] ss:$8 sps:$4 sm:$0xff]  }
 0x115   : > { %v595_v57 = vpack.c.bf16 %v541_v56, %v538_v53 }
 0x117   : > { %1074 = vmatprep.subr.bf16.mxu0 %v595_v57  ;;  %1206 = vmatprep.subr.bf16.mxu1 %v595_v57 }
 0x118   : > { %1075 = vmatpush3.bf16.msra.mxu0 %v587_v33  ;;  %1214 = vmatpush3.bf16.msra.mxu1 %v587_v33  ;;  %v1459_v33 = vld [vmem:[%s1522_s3] ss:$0 sm:$0xff] }
 0x119   : > { %v1198_v58 = vpop.f32.mrb[24].mxu0  ;;  %1076 = vmatprep.subr.bf16.mxu0 %v596_v55  ;;  %1207 = vmatprep.subr.bf16.mxu1 %v596_v55 }
 0x11a   : > { %v554_v59 = vpop.f32.mrb[25].mxu0 }
 0x11b   : > { %v1199_v60 = vpop.f32.mrb[26].mxu0 }
 0x11c   : > { %v598_v61 = vpack.c.bf16 %v1199_v60, %v1198_v58  ;;  %v557_v62 = vpop.f32.mrb[27].mxu0  ;;  %1077 = vmatpush3.bf16.msra.mxu0 %v588_v31  ;;  %1215 = vmatpush3.bf16.msra.mxu1 %v588_v31 }
 0x11d   : > { %v597_v63 = vpack.c.bf16 %v557_v62, %v554_v59 }
 0x11f   : > { %1078 = vmatprep.subr.bf16.mxu0 %v597_v63  ;;  %1208 = vmatprep.subr.bf16.mxu1 %v597_v63 }
 0x120   : > { %1079 = vmatpush3.bf16.msra.mxu0 %v589_v39  ;;  %1216 = vmatpush3.bf16.msra.mxu1 %v589_v39 }
 0x121   : > { %v1202_v0 = vpop.f32.mrb[28].mxu0  ;;  %1080 = vmatprep.subr.bf16.mxu0 %v598_v61  ;;  %1209 = vmatprep.subr.bf16.mxu1 %v598_v61 }
 0x122   : > { %v570_v1 = vpop.f32.mrb[29].mxu0 }
 0x123   : > { %v1203_v2 = vpop.f32.mrb[30].mxu0 }
 0x124   : > { %v600_v3 = vpack.c.bf16 %v1203_v2, %v1202_v0  ;;  %v573_v4 = vpop.f32.mrb[31].mxu0  ;;  %1081 = vmatpush3.bf16.msra.mxu0 %v590_v37  ;;  %1217 = vmatpush3.bf16.msra.mxu1 %v590_v37 }
 0x125   : > { %v599_v5 = vpack.c.bf16 %v573_v4, %v570_v1 }
 0x127   : > { %1082 = vmatprep.subr.bf16.mxu0 %v599_v5  ;;  %1210 = vmatprep.subr.bf16.mxu1 %v599_v5 }
 0x128   : > { %1083 = vmatpush3.bf16.msra.mxu0 %v591_v45  ;;  %1218 = vmatpush3.bf16.msra.mxu1 %v591_v45 }
 0x129   : > { %1084 = vmatprep.subr.bf16.mxu0 %v600_v3  ;;  %1211 = vmatprep.subr.bf16.mxu1 %v600_v3 }
 0x12c   : > { %1085 = vmatpush3.bf16.msra.mxu0 %v592_v43  ;;  %1219 = vmatpush3.bf16.msra.mxu1 %v592_v43 }
 0x12f   : > { %817 = vmatmul.mubr.bf16.vlgmr.msra.gmra.mrb[0].mxu1 %v1249_v6  ;;  %793 = vmatmul.mubr.bf16.vlgmr.msra.gmra.mrb[32].mxu0 %v1270_v7 }
 0x130   : > { %824 = vmatprep.mubr.bf16.mxu1 %v1252_v8  ;;  %800 = vmatprep.mubr.bf16.mxu0 %v1276_v9 }
 0x137   : > { %825 = vmatmul.mubr.bf16.gmra.mrb[4].mxu1 %v1254_v10  ;;  %801 = vmatmul.mubr.bf16.gmra.mrb[36].mxu0 %v1278_v11 }
 0x138   : > { %832 = vmatprep.mubr.bf16.mxu1 %v1255_v12  ;;  %808 = vmatprep.mubr.bf16.mxu0 %v1282_v13 }
 0x13f   : > { %833 = vmatmul.mubr.bf16.gmra.mrb[8].mxu1 %v1257_v14  ;;  %809 = vmatmul.mubr.bf16.gmra.mrb[40].mxu0 %v1284_v15 }
 0x140   : > { %840 = vmatprep.mubr.bf16.mxu1 %v1258_v16 }
 0x147   : > { %841 = vmatmul.mubr.bf16.gmra.mrb[12].mxu1 %v1260_v17 }
 0x148   : > { %848 = vmatprep.mubr.bf16.mxu1 %v1261_v18 }
 0x14f   : > { %849 = vmatmul.mubr.bf16.gmra.mrb[16].mxu1 %v1263_v19 }
 0x150   : > { %856 = vmatprep.mubr.bf16.mxu1 %v1264_v20 }
 0x157   : > { %857 = vmatmul.mubr.bf16.gmra.mrb[20].mxu1 %v1266_v21 }
 0x158   : > { %864 = vmatprep.mubr.bf16.mxu1 %v1267_v22 }
 0x15f   : > { %865 = vmatmul.mubr.bf16.gmra.mrb[24].mxu1 %v1269_v23 }
 0x160   : > { %872 = vmatprep.mubr.bf16.mxu1 %v1273_v24 }
 0x167   : > { %873 = vmatmul.mubr.bf16.gmra.mrb[28].mxu1 %v1275_v25 }
 0x168   : > { %880 = vmatprep.mubr.bf16.mxu1 %v1279_v26 }
 0x16f   : > { %881 = vmatmul.mubr.bf16.gmra.mrb[32].mxu1 %v1281_v28 }
 0x170   : > { %888 = vmatprep.mubr.bf16.mxu1 %v1046_v29 }
 0x177   : > { %889 = vmatmul.mubr.bf16.gmra.mrb[36].mxu1 %v1045_v30 }
 0x202   : > { %v1104_v31 = vpop.f32.mrb[0].mxu1  ;;  %v1086_v32 = vpop.f32.mrb[32].mxu0 }
 0x203   : > { %v1105_v34 = vpop.f32.mrb[1].mxu1  ;;  %v1087_v35 = vpop.f32.mrb[33].mxu0 }
 0x204   : > { %v1106_v36 = vadd.f32 %v1105_v34, %v1104_v31  ;;  %v1107_v37 = vpop.f32.mrb[2].mxu1  ;;  %v1088_v38 = vadd.f32 %v1087_v35, %v1086_v32  ;;  %v1089_v39 = vpop.f32.mrb[34].mxu0 }
 0x205   : > { %v1108_v40 = vpop.f32.mrb[3].mxu1  ;;  %v1090_v41 = vpop.f32.mrb[35].mxu0 }
 0x206   : > { %v819_v42 = vadd.f32 %v1106_v36, %v1459_v33  ;;  %v1109_v43 = vadd.f32 %v1108_v40, %v1107_v37  ;;  %v795_v44 = vadd.f32 %v1088_v38, %v1459_v33  ;;  %v1091_v45 = vadd.f32 %v1090_v41, %v1089_v39 }
 0x208   : > { %902 = vst [vmem:[%s1464_s10 + $0x30] sm:$0xff] %v819_v42  ;;  %v822_v46 = vadd.f32 %v1109_v43, %v1459_v33  ;;  %896 = vst [vmem:[%s1464_s10] sm:$0xff] %v795_v44  ;;  %v798_v47 = vadd.f32 %v1091_v45, %v1459_v33 }
 0x20a   : > { %903 = vst [vmem:[%s1464_s10 + $0x38] sm:$0xff] %v822_v46  ;;  %v1110_v48 = vpop.f32.mrb[4].mxu1  ;;  %897 = vst [vmem:[%s1464_s10 + $0x8] sm:$0xff] %v798_v47  ;;  %v1092_v49 = vpop.f32.mrb[36].mxu0 }
 0x20b   : > { %v1111_v50 = vpop.f32.mrb[5].mxu1  ;;  %v1093_v51 = vpop.f32.mrb[37].mxu0 }
 0x20c   : > { %v1112_v52 = vadd.f32 %v1111_v50, %v1110_v48  ;;  %v1113_v53 = vpop.f32.mrb[6].mxu1  ;;  %v1094_v54 = vadd.f32 %v1093_v51, %v1092_v49  ;;  %v1095_v55 = vpop.f32.mrb[38].mxu0 }
 0x20d   : > { %v1114_v56 = vpop.f32.mrb[7].mxu1  ;;  %v1096_v57 = vpop.f32.mrb[39].mxu0 }
 0x20e   : > { %v827_v58 = vadd.f32 %v1112_v52, %v1459_v33  ;;  %v1115_v59 = vadd.f32 %v1114_v56, %v1113_v53  ;;  %v803_v60 = vadd.f32 %v1094_v54, %v1459_v33  ;;  %v1097_v61 = vadd.f32 %v1096_v57, %v1095_v55 }
 0x210   : > { %904 = vst [vmem:[%s1464_s10 + $0x40] sm:$0xff] %v827_v58  ;;  %v830_v62 = vadd.f32 %v1115_v59, %v1459_v33  ;;  %898 = vst [vmem:[%s1464_s10 + $0x10] sm:$0xff] %v803_v60  ;;  %v806_v63 = vadd.f32 %v1097_v61, %v1459_v33 }
 0x212   : > { %905 = vst [vmem:[%s1464_s10 + $0x48] sm:$0xff] %v830_v62  ;;  %v1116_v0 = vpop.f32.mrb[8].mxu1  ;;  %899 = vst [vmem:[%s1464_s10 + $0x18] sm:$0xff] %v806_v63  ;;  %v1098_v1 = vpop.f32.mrb[40].mxu0 }
 0x213   : > { %v1117_v2 = vpop.f32.mrb[9].mxu1  ;;  %v1099_v3 = vpop.f32.mrb[41].mxu0 }
 0x214   : > { %v1118_v4 = vadd.f32 %v1117_v2, %v1116_v0  ;;  %v1119_v5 = vpop.f32.mrb[10].mxu1  ;;  %v1100_v6 = vadd.f32 %v1099_v3, %v1098_v1  ;;  %v1101_v7 = vpop.f32.mrb[42].mxu0 }
 0x215   : > { %v1120_v8 = vpop.f32.mrb[11].mxu1  ;;  %v1102_v9 = vpop.f32.mrb[43].mxu0 }
 0x216   : > { %v835_v10 = vadd.f32 %v1118_v4, %v1459_v33  ;;  %v1121_v11 = vadd.f32 %v1120_v8, %v1119_v5  ;;  %v811_v12 = vadd.f32 %v1100_v6, %v1459_v33  ;;  %v1103_v13 = vadd.f32 %v1102_v9, %v1101_v7 }
 0x218   : > { %906 = vst [vmem:[%s1464_s10 + $0x50] sm:$0xff] %v835_v10  ;;  %v838_v14 = vadd.f32 %v1121_v11, %v1459_v33  ;;  %900 = vst [vmem:[%s1464_s10 + $0x20] sm:$0xff] %v811_v12  ;;  %v814_v15 = vadd.f32 %v1103_v13, %v1459_v33 }
 0x21a   : > { %907 = vst [vmem:[%s1464_s10 + $0x58] sm:$0xff] %v838_v14  ;;  %v1122_v16 = vpop.f32.mrb[12].mxu1  ;;  %901 = vst [vmem:[%s1464_s10 + $0x28] sm:$0xff] %v814_v15 }
 0x21b   : > { %v1123_v17 = vpop.f32.mrb[13].mxu1 }
 0x21c   : > { %v1124_v18 = vadd.f32 %v1123_v17, %v1122_v16  ;;  %v1125_v19 = vpop.f32.mrb[14].mxu1 }
 0x21d   : > { %v1126_v20 = vpop.f32.mrb[15].mxu1 }
 0x21e   : > { %v843_v21 = vadd.f32 %v1124_v18, %v1459_v33  ;;  %v1127_v22 = vadd.f32 %v1126_v20, %v1125_v19 }
 0x220   : > { %908 = vst [vmem:[%s1464_s10 + $0x60] sm:$0xff] %v843_v21  ;;  %v846_v23 = vadd.f32 %v1127_v22, %v1459_v33 }
 0x222   : > { %909 = vst [vmem:[%s1464_s10 + $0x68] sm:$0xff] %v846_v23  ;;  %v1128_v24 = vpop.f32.mrb[16].mxu1 }
 0x223   : > { %v1129_v25 = vpop.f32.mrb[17].mxu1 }
 0x224   : > { %v1130_v26 = vadd.f32 %v1129_v25, %v1128_v24  ;;  %v1131_v27 = vpop.f32.mrb[18].mxu1 }
 0x225   : > { %v1132_v28 = vpop.f32.mrb[19].mxu1 }
 0x226   : > { %v851_v29 = vadd.f32 %v1130_v26, %v1459_v33  ;;  %v1133_v30 = vadd.f32 %v1132_v28, %v1131_v27 }
 0x228   : > { %910 = vst [vmem:[%s1464_s10 + $0x70] sm:$0xff] %v851_v29  ;;  %v854_v31 = vadd.f32 %v1133_v30, %v1459_v33 }
 0x22a   : > { %911 = vst [vmem:[%s1464_s10 + $0x78] sm:$0xff] %v854_v31  ;;  %v1134_v32 = vpop.f32.mrb[20].mxu1 }
 0x22b   : > { %v1135_v34 = vpop.f32.mrb[21].mxu1 }
 0x22c   : > { %v1136_v35 = vadd.f32 %v1135_v34, %v1134_v32  ;;  %v1137_v36 = vpop.f32.mrb[22].mxu1 }
 0x22d   : > { %v1138_v37 = vpop.f32.mrb[23].mxu1 }
 0x22e   : > { %v859_v38 = vadd.f32 %v1136_v35, %v1459_v33  ;;  %v1139_v39 = vadd.f32 %v1138_v37, %v1137_v36 }
 0x230   : > { %912 = vst [vmem:[%s1464_s10 + $0x80] sm:$0xff] %v859_v38  ;;  %v862_v40 = vadd.f32 %v1139_v39, %v1459_v33 }
 0x232   : > { %913 = vst [vmem:[%s1464_s10 + $0x88] sm:$0xff] %v862_v40  ;;  %v1140_v41 = vpop.f32.mrb[24].mxu1 }
 0x233   : > { %v1141_v42 = vpop.f32.mrb[25].mxu1 }
 0x234   : > { %v1142_v43 = vadd.f32 %v1141_v42, %v1140_v41  ;;  %v1143_v44 = vpop.f32.mrb[26].mxu1 }
 0x235   : > { %v1144_v45 = vpop.f32.mrb[27].mxu1 }
 0x236   : > { %v867_v46 = vadd.f32 %v1142_v43, %v1459_v33  ;;  %v1145_v47 = vadd.f32 %v1144_v45, %v1143_v44 }
 0x238   : > { %914 = vst [vmem:[%s1464_s10 + $0x90] sm:$0xff] %v867_v46  ;;  %v870_v48 = vadd.f32 %v1145_v47, %v1459_v33 }
 0x23a   : > { %915 = vst [vmem:[%s1464_s10 + $0x98] sm:$0xff] %v870_v48  ;;  %v1146_v49 = vpop.f32.mrb[28].mxu1 }
 0x23b   : > { %v1147_v50 = vpop.f32.mrb[29].mxu1 }
 0x23c   : > { %v1148_v51 = vadd.f32 %v1147_v50, %v1146_v49  ;;  %v1149_v52 = vpop.f32.mrb[30].mxu1 }
 0x23d   : > { %v1150_v53 = vpop.f32.mrb[31].mxu1 }
 0x23e   : > { %v875_v54 = vadd.f32 %v1148_v51, %v1459_v33  ;;  %v1151_v55 = vadd.f32 %v1150_v53, %v1149_v52 }
 0x240   : > { %916 = vst [vmem:[%s1464_s10 + $0xa0] sm:$0xff] %v875_v54  ;;  %v878_v56 = vadd.f32 %v1151_v55, %v1459_v33 }
 0x242   : > { %917 = vst [vmem:[%s1464_s10 + $0xa8] sm:$0xff] %v878_v56  ;;  %v1152_v57 = vpop.f32.mrb[32].mxu1 }
 0x243   : > { %v1153_v58 = vpop.f32.mrb[33].mxu1 }
 0x244   : > { %v1154_v59 = vadd.f32 %v1153_v58, %v1152_v57  ;;  %v1155_v60 = vpop.f32.mrb[34].mxu1 }
 0x245   : > { %v1156_v61 = vpop.f32.mrb[35].mxu1 }
 0x246   : > { %v883_v62 = vadd.f32 %v1154_v59, %v1459_v33  ;;  %v1157_v63 = vadd.f32 %v1156_v61, %v1155_v60 }
 0x248   : > { %918 = vst [vmem:[%s1464_s10 + $0xb0] sm:$0xff] %v883_v62  ;;  %v886_v0 = vadd.f32 %v1157_v63, %v1459_v33 }
 0x24a   : > { %919 = vst [vmem:[%s1464_s10 + $0xb8] sm:$0xff] %v886_v0  ;;  %v1158_v1 = vpop.f32.mrb[36].mxu1 }
 0x24b   : > { %v1159_v2 = vpop.f32.mrb[37].mxu1 }
 0x24c   : > { %v1160_v3 = vadd.f32 %v1159_v2, %v1158_v1  ;;  %v1161_v4 = vpop.f32.mrb[38].mxu1 }
 0x24d   : > { %v1162_v5 = vpop.f32.mrb[39].mxu1 }
 0x24e   : > { %v891_v6 = vadd.f32 %v1160_v3, %v1459_v33 }
 0x250   : > { %920 = vst [vmem:[%s1464_s10 + $0xc0] sm:$0xf] %v891_v6 }
 0x251 PF: > { %s14_s15 = sadd.s32 1, %s1293_s15  }
 0x252   : > { %p11_p4 = scmp.ge.s32.totalorder %s14_s15, 4  }
 0x254   :  { %13 = sbr.rel (!%p11_p4) target bundleno = 1 (0x1), region = 66 }

</bundles_post_ra>
